<compile_context>
chip_gen: v6e
topology: v6e:2x2x1
jax: 0.10.0
libtpu: 0.0.40
codegen_flags: <defaults>
</compile_context>

<pallas_src>
import functools

import numpy as np
import jax
import jax.numpy as jnp
from jax import lax
from jax.experimental import pallas as pl
from jax.experimental.pallas import tpu as pltpu


def _triplet_kernel(x_ref, lx_ref, tcol_ref, trow_ref, loss_ref, lloss_ref,
                    gram_ref, *, margin, n_real):
    k = pl.program_id(0)
    n = gram_ref.shape[0]                      # padded (lane-dense) batch size

    xt = x_ref[...]                            # (N, tk) in the MXU dtype
    prod = lax.dot_general(                    # (N, N) = X_k X_k^T, f32 acc
        xt, xt, (((1,), (1,)), ((), ())),
        preferred_element_type=jnp.float32)

    @pl.when(k == 0)
    def _first():
        gram_ref[...] = prod                   # no separate zero-init pass

    @pl.when(k != 0)
    def _accum():
        gram_ref[...] += prod

    @pl.when(k == pl.num_programs(0) - 1)
    def _finalize():
        gram = gram_ref[...]                   # (N, N) f32

        # Local Gram matrix computed here (LX is resident); no scratch held
        # across the accumulation loop.
        lxt = lx_ref[...]
        lgram = lax.dot_general(
            lxt, lxt, (((1,), (1,)), ((), ())),
            preferred_element_type=jnp.float32)

        col_ids = lax.broadcasted_iota(jnp.int32, (n, n), 1)
        diag = lax.broadcasted_iota(jnp.int32, (n, n), 0) == col_ids

        # Row norms from the Gram diagonals: one masked select per matrix,
        # reused for both the (N,1) and (1,N) reductions.  (A transpose of
        # the (N,1) form would save one XLU pass but the reduce lowers
        # unconditionally on all generations, so we keep it.)
        gdiag = jnp.where(diag, gram, 0.0)
        ldiag = jnp.where(diag, lgram, 0.0)
        sq_col = jnp.sum(gdiag, axis=1, keepdims=True)     # (N, 1) ||x_i||^2
        sq_row = jnp.sum(gdiag, axis=0, keepdims=True)     # (1, N)
        lsq_col = jnp.sum(ldiag, axis=1, keepdims=True)
        lsq_row = jnp.sum(ldiag, axis=0, keepdims=True)

        # "half" distances: dist2[i, j] - ||x_i||^2.  The per-row offset does
        # not change argmax / argmin / ties, so mining runs on these directly
        # (no sqrt over the (N, N) matrices).
        half = sq_row - 2.0 * gram
        lhalf = lsq_row - 2.0 * lgram

        # Padded rows/columns are excluded by index (padded label values are
        # irrelevant).
        col_valid = col_ids < n_real
        same = tcol_ref[...] == trow_ref[...]              # (N, N) labels
        pos_valid = jnp.logical_and(
            jnp.logical_and(same, jnp.logical_not(diag)), col_valid)
        neg_valid = jnp.logical_and(jnp.logical_not(same), col_valid)

        NEG_INF = jnp.float32(-1e30)
        POS_INF = jnp.float32(1e30)
        ap_half = jnp.max(jnp.where(pos_valid, half, NEG_INF),
                          axis=1, keepdims=True)
        an_half = jnp.min(jnp.where(neg_valid, half, POS_INF),
                          axis=1, keepdims=True)

        # First (smallest) index achieving the max / min — matches the PyTorch
        # loop's strict-inequality tie-break.  Comparison is against the same
        # f32-accumulated tensor the extrema came from, so it's exact.
        big = jnp.int32(n)
        p_idx = jnp.min(
            jnp.where(jnp.logical_and(pos_valid, half == ap_half), col_ids, big),
            axis=1, keepdims=True)
        n_idx = jnp.min(
            jnp.where(jnp.logical_and(neg_valid, half == an_half), col_ids, big),
            axis=1, keepdims=True)

        eps = jnp.float32(1e-12)
        # Global distances: the mined extremum IS the gathered value.
        dist_ap = jnp.sqrt(jnp.maximum(sq_col + ap_half, eps))         # (N, 1)
        dist_an = jnp.sqrt(jnp.maximum(sq_col + an_half, eps))
        # Local distances: gather lhalf at the mined indices (one-hot reduce).
        lgath_ap = jnp.sum(jnp.where(col_ids == p_idx, lhalf, 0.0),
                           axis=1, keepdims=True)
        lgath_an = jnp.sum(jnp.where(col_ids == n_idx, lhalf, 0.0),
                           axis=1, keepdims=True)
        ldist_ap = jnp.sqrt(jnp.maximum(lsq_col + lgath_ap, eps))
        ldist_an = jnp.sqrt(jnp.maximum(lsq_col + lgath_an, eps))

        # Margin ranking loss with y = 1: mean(max(0, ap - an + margin)) over
        # the *real* rows only.
        # NOTE: a row with no valid positive (singleton class) clamps its ap
        # distance to ~0 here, while the PyTorch loop would index p_pos=-1;
        # identical behavior for well-formed PK-sampled batches.
        hinge = jnp.maximum(dist_ap - dist_an + margin, 0.0)
        lhinge = jnp.maximum(ldist_ap - ldist_an + margin, 0.0)
        row_valid = lax.broadcasted_iota(jnp.int32, (n, 1), 0) < n_real
        inv = jnp.float32(1.0 / n_real)
        loss_ref[...] = jnp.sum(jnp.where(row_valid, hinge, 0.0),
                                axis=0, keepdims=True) * inv
        lloss_ref[...] = jnp.sum(jnp.where(row_valid, lhinge, 0.0),
                                 axis=0, keepdims=True) * inv


def _round_up(v, m):
    return (v + m - 1) // m * m


def triplet_loss_pallas(inputs, local_inputs, targets, margin=0.3, *,
                        use_bf16_mxu=False, block_k=2048):
    """Returns (global_loss, local_features_loss), matching TripletLoss.forward."""
    n, d = inputs.shape
    dl = local_inputs.shape[1]
    assert block_k % 128 == 0

    mxu_dtype = jnp.bfloat16 if use_bf16_mxu else jnp.float32
    x = inputs.astype(mxu_dtype)
    lx = local_inputs.astype(mxu_dtype)

    # K tiling: skipped entirely when the whole feature dim fits one (large)
    # block — the common case for triplet-loss shapes.  Otherwise lane-aligned
    # block_k tiles over a zero-padded D (padding leaves the Gram unchanged).
    if d <= block_k:
        tk, kt = d, 1
    else:
        tk = block_k
        d_pad = _round_up(d, tk)
        if d_pad != d:
            x = jnp.pad(x, ((0, 0), (0, d_pad - d)))
        kt = d_pad // tk

    # Pad N to a lane-dense multiple of 128.  Padded rows/cols are excluded by
    # index inside the kernel, so the padded label value is irrelevant.
    n_pad = max(_round_up(n, 128), 128)
    targets_i = targets.astype(jnp.int32)
    if n_pad != n:
        x = jnp.pad(x, ((0, n_pad - n), (0, 0)))
        lx = jnp.pad(lx, ((0, n_pad - n), (0, 0)))
        targets_i = jnp.pad(targets_i, (0, n_pad - n), constant_values=-1)

    tcol = targets_i.reshape(n_pad, 1)
    trow = targets_i.reshape(1, n_pad)

    # VMEM budget: double-buffered X K-tiles + resident LX + (N,N) Gram
    # scratch + headroom for the finalize-phase (N,N) temporaries, capped per
    # generation from the physical VMEM capacity.
    in_bytes = 2 if use_bf16_mxu else 4
    est = (2 * n_pad * tk * in_bytes
           + 2 * n_pad * dl * in_bytes
           + n_pad * n_pad * 4
           + 10 * n_pad * n_pad * 4
           + (1 << 20))
    try:
        phys = pltpu.get_tpu_info().vmem_capacity_bytes
    except Exception:
        phys = 64 << 20                      # conservative (v7x physical)
    vmem_limit = int(min(max(int(1.3 * est), 32 << 20), int(phys * 0.85)))
    # TODO(synk): if est exceeds the per-generation cap (very large N on v7x),
    # row-tile the finalize phase instead of relying on this single cap.

    kernel = functools.partial(_triplet_kernel, margin=float(margin), n_real=n)
    loss, lloss = pl.pallas_call(
        kernel,
        grid=(kt,),
        in_specs=[
            pl.BlockSpec((n_pad, tk), lambda k: (0, k)),    # X: K-tiled, pipelined
            pl.BlockSpec((n_pad, dl), lambda k: (0, 0)),    # LX: resident block
            pl.BlockSpec((n_pad, 1), lambda k: (0, 0)),     # labels (column)
            pl.BlockSpec((1, n_pad), lambda k: (0, 0)),     # labels (row)
        ],
        out_specs=(
            pl.BlockSpec((1, 1), lambda k: (0, 0)),
            pl.BlockSpec((1, 1), lambda k: (0, 0)),
        ),
        out_shape=(
            jax.ShapeDtypeStruct((1, 1), jnp.float32),
            jax.ShapeDtypeStruct((1, 1), jnp.float32),
        ),
        scratch_shapes=[
            pltpu.VMEM((n_pad, n_pad), jnp.float32),   # global Gram accumulator
        ],
        compiler_params=pltpu.CompilerParams(
            dimension_semantics=("arbitrary",),        # K is a reduction axis
            vmem_limit_bytes=vmem_limit),
    )(x, lx, tcol, trow)
    return loss[0, 0], lloss[0, 0]


def _reference_triplet(inputs, local_inputs, targets, margin=0.3):
    """Pure-numpy replica of the PyTorch forward (double precision)."""
    x = np.asarray(inputs, np.float64)
    lx = np.asarray(local_inputs, np.float64)
    t = np.asarray(targets)
    n = x.shape[0]
    sq = (x ** 2).sum(1, keepdims=True)
    dist = sq + sq.T - 2.0 * x @ x.T
    dist = np.sqrt(np.clip(dist, 1e-12, None))
    mask = t[:, None] == t[None, :]

    def local_d(a, b):
        tmp = lx[a] @ lx[a] + lx[b] @ lx[b] - 2.0 * (lx[a] @ lx[b])
        return np.sqrt(max(tmp, 1e-12))

    dist_ap, dist_an, lap, lan = [], [], [], []
    for i in range(n):
        p_pos, p_max, n_pos, n_min = -1, 0.0, -1, 0.0
        for j in range(n):
            if i == j:
                continue
            if (not mask[i][j]) and (n_pos == -1 or n_min > dist[i][j]):
                n_pos, n_min = j, dist[i][j]
            if mask[i][j] and (p_pos == -1 or p_max < dist[i][j]):
                p_pos, p_max = j, dist[i][j]
        dist_ap.append(dist[i][p_pos])
        dist_an.append(dist[i][n_pos])
        lap.append(local_d(i, p_pos))
        lan.append(local_d(i, n_pos))
    dist_ap, dist_an = np.array(dist_ap), np.array(dist_an)
    lap, lan = np.array(lap), np.array(lan)
    loss = np.mean(np.maximum(dist_ap - dist_an + margin, 0.0))
    lloss = np.mean(np.maximum(lap - lan + margin, 0.0))
    return loss, lloss


if __name__ == "__main__":
    key = jax.random.PRNGKey(0)
    k1, k2 = jax.random.split(key)

    N, D, DL = 8, 32, 16
    inputs = jax.random.normal(k1, (N, D), dtype=jnp.float32)
    local_inputs = jax.random.normal(k2, (N, DL), dtype=jnp.float32)
    targets = jnp.array([0, 0, 0, 0, 1, 1, 1, 1], dtype=jnp.int32)

    # f32 path: faithful to the PyTorch module's numerics.
    loss, local_loss = triplet_loss_pallas(inputs, local_inputs, targets, margin=0.3)
    loss = jax.block_until_ready(loss)
    local_loss = jax.block_until_ready(local_loss)

    ref_loss, ref_local_loss = _reference_triplet(
        np.asarray(inputs), np.asarray(local_inputs), np.asarray(targets), margin=0.3)

    np.testing.assert_allclose(float(loss), ref_loss, rtol=1e-3, atol=1e-3)
    np.testing.assert_allclose(float(local_loss), ref_local_loss, rtol=1e-3, atol=1e-3)

    # bf16-MXU fast path (recommended on v6e/v7x when distance tolerance allows).
    bloss, blocal = triplet_loss_pallas(inputs, local_inputs, targets, margin=0.3,
                                        use_bf16_mxu=True)
    bloss = jax.block_until_ready(bloss)
    blocal = jax.block_until_ready(blocal)
    assert np.isfinite(float(bloss)) and np.isfinite(float(blocal))
    assert abs(float(bloss) - ref_loss) < 0.15

    print("KERNEL_OK")
</pallas_src>

<mosaic_0001>
module attributes {stable_mosaic.version = 11 : i64} {
  func.func @_triplet_kernel(%arg0: i32, %arg1: memref<128x32xf32, #tpu.memory_space<vmem>>, %arg2: memref<128x16xf32, #tpu.memory_space<vmem>>, %arg3: memref<128x1xi32, #tpu.memory_space<vmem>>, %arg4: memref<1x128xi32, #tpu.memory_space<vmem>>, %arg5: memref<1x1xf32, #tpu.memory_space<vmem>>, %arg6: memref<1x1xf32, #tpu.memory_space<vmem>>, %arg7: memref<128x128xf32, #tpu.memory_space<vmem>>) attributes {dimension_semantics = [#tpu.dimension_semantics<arbitrary>], iteration_bounds = array<i64: 1>, scalar_prefetch = 0 : i64, scratch_operands = 1 : i64, tpu.core_type = #tpu.core_type<tc>, window_params = [{transform_indices = @transform_0, window_bounds = array<i64: 128, 32>}, {pipeline_mode = #tpu.pipeline_mode<synchronous>, transform_indices = @transform_1, window_bounds = array<i64: 128, 16>}, {pipeline_mode = #tpu.pipeline_mode<synchronous>, transform_indices = @transform_2, window_bounds = array<i64: 128, 1>}, {pipeline_mode = #tpu.pipeline_mode<synchronous>, transform_indices = @transform_3, window_bounds = array<i64: 1, 128>}, {pipeline_mode = #tpu.pipeline_mode<synchronous>, transform_indices = @transform_4, window_bounds = array<i64: 1, 1>}, {pipeline_mode = #tpu.pipeline_mode<synchronous>, transform_indices = @transform_5, window_bounds = array<i64: 1, 1>}]} {
    %c0 = arith.constant 0 : index
    %c0_0 = arith.constant 0 : index
    %0 = vector.load %arg1[%c0, %c0_0] : memref<128x32xf32, #tpu.memory_space<vmem>>, vector<128x32xf32>
    %cst = arith.constant dense<0.000000e+00> : vector<128x128xf32>
    %1 = tpu.matmul %0, %0, %cst {dimension_numbers = #tpu.dot_dimension_numbers<[1], [1], [0], [0], [0, 0, 1, 0], [], []>} : vector<128x32xf32>, vector<128x32xf32>, vector<128x128xf32> -> vector<128x128xf32>
    %c0_i32 = arith.constant 0 : i32
    %2 = arith.cmpi eq, %arg0, %c0_i32 : i32
    %3 = arith.extui %2 : i1 to i32
    %c0_i32_1 = arith.constant 0 : i32
    %4 = arith.cmpi ne, %3, %c0_i32_1 : i32
    scf.if %4 {
      %c0_6 = arith.constant 0 : index
      %c0_7 = arith.constant 0 : index
      %11 = vector.load %arg7[%c0_6, %c0_7] : memref<128x128xf32, #tpu.memory_space<vmem>>, vector<128x128xf32>
      tpu.vector_store %arg7[%c0_6, %c0_7], %1 {strides = array<i32>} : memref<128x128xf32, #tpu.memory_space<vmem>>, vector<128x128xf32>,
    } else {
    }
    %c0_i32_2 = arith.constant 0 : i32
    %5 = arith.cmpi ne, %arg0, %c0_i32_2 : i32
    %6 = arith.extui %5 : i1 to i32
    %c0_i32_3 = arith.constant 0 : i32
    %7 = arith.cmpi ne, %6, %c0_i32_3 : i32
    scf.if %7 {
      %c0_6 = arith.constant 0 : index
      %c0_7 = arith.constant 0 : index
      %11 = vector.load %arg7[%c0_6, %c0_7] : memref<128x128xf32, #tpu.memory_space<vmem>>, vector<128x128xf32>
      %12 = arith.addf %11, %1 : vector<128x128xf32>
      %c0_8 = arith.constant 0 : index
      %c0_9 = arith.constant 0 : index
      %13 = vector.load %arg7[%c0_8, %c0_9] : memref<128x128xf32, #tpu.memory_space<vmem>>, vector<128x128xf32>
      tpu.vector_store %arg7[%c0_8, %c0_9], %12 {strides = array<i32>} : memref<128x128xf32, #tpu.memory_space<vmem>>, vector<128x128xf32>,
    } else {
    }
    %c0_i32_4 = arith.constant 0 : i32
    %8 = arith.cmpi eq, %arg0, %c0_i32_4 : i32
    %9 = arith.extui %8 : i1 to i32
    %c0_i32_5 = arith.constant 0 : i32
    %10 = arith.cmpi ne, %9, %c0_i32_5 : i32
    scf.if %10 {
      %c0_6 = arith.constant 0 : index
      %c0_7 = arith.constant 0 : index
      %11 = vector.load %arg7[%c0_6, %c0_7] : memref<128x128xf32, #tpu.memory_space<vmem>>, vector<128x128xf32>
      %c0_8 = arith.constant 0 : index
      %c0_9 = arith.constant 0 : index
      %12 = vector.load %arg2[%c0_8, %c0_9] : memref<128x16xf32, #tpu.memory_space<vmem>>, vector<128x16xf32>
      %cst_10 = arith.constant dense<0.000000e+00> : vector<128x128xf32>
      %13 = tpu.matmul %12, %12, %cst_10 {dimension_numbers = #tpu.dot_dimension_numbers<[1], [1], [0], [0], [0, 0, 1, 0], [], []>} : vector<128x16xf32>, vector<128x16xf32>, vector<128x128xf32> -> vector<128x128xf32>
      %14 = tpu.iota {dimensions = array<i32: 1>} : vector<128x128xi32>
      %15 = tpu.iota {dimensions = array<i32: 0>} : vector<128x128xi32>
      %16 = arith.cmpi eq, %15, %14 : vector<128x128xi32>
      %cst_11 = arith.constant 0.000000e+00 : f32
      %17 = vector.broadcast %cst_11 : f32 to vector<128x128xf32>
      %18 = arith.select %16, %11, %17 : vector<128x128xi1>, vector<128x128xf32>
      %cst_12 = arith.constant 0.000000e+00 : f32
      %19 = vector.broadcast %cst_12 : f32 to vector<128x128xf32>
      %20 = arith.select %16, %13, %19 : vector<128x128xi1>, vector<128x128xf32>
      %cst_13 = arith.constant dense<0.000000e+00> : vector<128xf32>
      %21 = vector.multi_reduction <add>, %18, %cst_13 [1] : vector<128x128xf32> to vector<128xf32>
      %22 = vector.shape_cast %21 : vector<128xf32> to vector<128x1xf32>
      %cst_14 = arith.constant dense<0.000000e+00> : vector<128xf32>
      %23 = vector.multi_reduction <add>, %18, %cst_14 [0] : vector<128x128xf32> to vector<128xf32>
      %24 = vector.shape_cast %23 : vector<128xf32> to vector<1x128xf32>
      %cst_15 = arith.constant dense<0.000000e+00> : vector<128xf32>
      %25 = vector.multi_reduction <add>, %20, %cst_15 [1] : vector<128x128xf32> to vector<128xf32>
      %26 = vector.shape_cast %25 : vector<128xf32> to vector<128x1xf32>
      %cst_16 = arith.constant dense<0.000000e+00> : vector<128xf32>
      %27 = vector.multi_reduction <add>, %20, %cst_16 [0] : vector<128x128xf32> to vector<128xf32>
      %28 = vector.shape_cast %27 : vector<128xf32> to vector<1x128xf32>
      %cst_17 = arith.constant 2.000000e+00 : f32
      %29 = vector.broadcast %cst_17 : f32 to vector<128x128xf32>
      %30 = arith.mulf %29, %11 : vector<128x128xf32>
      %31 = vector.broadcast %24 : vector<1x128xf32> to vector<128x128xf32>
      %32 = arith.subf %31, %30 : vector<128x128xf32>
      %cst_18 = arith.constant 2.000000e+00 : f32
      %33 = vector.broadcast %cst_18 : f32 to vector<128x128xf32>
      %34 = arith.mulf %33, %13 : vector<128x128xf32>
      %35 = vector.broadcast %28 : vector<1x128xf32> to vector<128x128xf32>
      %36 = arith.subf %35, %34 : vector<128x128xf32>
      %c8_i32 = arith.constant 8 : i32
      %37 = vector.broadcast %c8_i32 : i32 to vector<128x128xi32>
      %38 = arith.cmpi slt, %14, %37 : vector<128x128xi32>
      %c0_19 = arith.constant 0 : index
      %c0_20 = arith.constant 0 : index
      %39 = vector.load %arg3[%c0_19, %c0_20] : memref<128x1xi32, #tpu.memory_space<vmem>>, vector<128x1xi32>
      %c0_21 = arith.constant 0 : index
      %c0_22 = arith.constant 0 : index
      %40 = vector.load %arg4[%c0_21, %c0_22] : memref<1x128xi32, #tpu.memory_space<vmem>>, vector<1x128xi32>
      %41 = vector.broadcast %39 : vector<128x1xi32> to vector<128x128xi32>
      %42 = vector.broadcast %40 : vector<1x128xi32> to vector<128x128xi32>
      %43 = arith.cmpi eq, %41, %42 : vector<128x128xi32>
      %cst_23 = arith.constant dense<true> : vector<128x128xi1>
      %44 = arith.xori %16, %cst_23 : vector<128x128xi1>
      %45 = arith.andi %43, %44 : vector<128x128xi1>
      %46 = arith.andi %45, %38 : vector<128x128xi1>
      %cst_24 = arith.constant dense<true> : vector<128x128xi1>
      %47 = arith.xori %43, %cst_24 : vector<128x128xi1>
      %48 = arith.andi %47, %38 : vector<128x128xi1>
      %cst_25 = arith.constant -1.000000e+30 : f32
      %49 = vector.broadcast %cst_25 : f32 to vector<128x128xf32>
      %50 = arith.select %46, %32, %49 : vector<128x128xi1>, vector<128x128xf32>
      %cst_26 = arith.constant dense<0xFF800000> : vector<128xf32>
      %51 = vector.multi_reduction <maximumf>, %50, %cst_26 [1] : vector<128x128xf32> to vector<128xf32>
      %52 = vector.shape_cast %51 : vector<128xf32> to vector<128x1xf32>
      %cst_27 = arith.constant 1.000000e+30 : f32
      %53 = vector.broadcast %cst_27 : f32 to vector<128x128xf32>
      %54 = arith.select %48, %32, %53 : vector<128x128xi1>, vector<128x128xf32>
      %cst_28 = arith.constant dense<0x7F800000> : vector<128xf32>
      %55 = vector.multi_reduction <minimumf>, %54, %cst_28 [1] : vector<128x128xf32> to vector<128xf32>
      %56 = vector.shape_cast %55 : vector<128xf32> to vector<128x1xf32>
      %57 = vector.broadcast %52 : vector<128x1xf32> to vector<128x128xf32>
      %58 = arith.cmpf oeq, %32, %57 : vector<128x128xf32>
      %59 = arith.andi %46, %58 : vector<128x128xi1>
      %c128_i32 = arith.constant 128 : i32
      %60 = vector.broadcast %c128_i32 : i32 to vector<128x128xi32>
      %61 = arith.select %59, %14, %60 : vector<128x128xi1>, vector<128x128xi32>
      %cst_29 = arith.constant dense<2147483647> : vector<128xi32>
      %62 = vector.multi_reduction <minsi>, %61, %cst_29 [1] : vector<128x128xi32> to vector<128xi32>
      %63 = vector.shape_cast %62 : vector<128xi32> to vector<128x1xi32>
      %64 = vector.broadcast %56 : vector<128x1xf32> to vector<128x128xf32>
      %65 = arith.cmpf oeq, %32, %64 : vector<128x128xf32>
      %66 = arith.andi %48, %65 : vector<128x128xi1>
      %c128_i32_30 = arith.constant 128 : i32
      %67 = vector.broadcast %c128_i32_30 : i32 to vector<128x128xi32>
      %68 = arith.select %66, %14, %67 : vector<128x128xi1>, vector<128x128xi32>
      %cst_31 = arith.constant dense<2147483647> : vector<128xi32>
      %69 = vector.multi_reduction <minsi>, %68, %cst_31 [1] : vector<128x128xi32> to vector<128xi32>
      %70 = vector.shape_cast %69 : vector<128xi32> to vector<128x1xi32>
      %71 = arith.addf %22, %52 : vector<128x1xf32>
      %cst_32 = arith.constant 9.99999996E-13 : f32
      %72 = vector.broadcast %cst_32 : f32 to vector<128x1xf32>
      %73 = arith.maximumf %71, %72 : vector<128x1xf32>
      %74 = math.sqrt %73 : vector<128x1xf32>
      %75 = arith.addf %22, %56 : vector<128x1xf32>
      %cst_33 = arith.constant 9.99999996E-13 : f32
      %76 = vector.broadcast %cst_33 : f32 to vector<128x1xf32>
      %77 = arith.maximumf %75, %76 : vector<128x1xf32>
      %78 = math.sqrt %77 : vector<128x1xf32>
      %79 = vector.broadcast %63 : vector<128x1xi32> to vector<128x128xi32>
      %80 = arith.cmpi eq, %14, %79 : vector<128x128xi32>
      %cst_34 = arith.constant 0.000000e+00 : f32
      %81 = vector.broadcast %cst_34 : f32 to vector<128x128xf32>
      %82 = arith.select %80, %36, %81 : vector<128x128xi1>, vector<128x128xf32>
      %cst_35 = arith.constant dense<0.000000e+00> : vector<128xf32>
      %83 = vector.multi_reduction <add>, %82, %cst_35 [1] : vector<128x128xf32> to vector<128xf32>
      %84 = vector.shape_cast %83 : vector<128xf32> to vector<128x1xf32>
      %85 = vector.broadcast %70 : vector<128x1xi32> to vector<128x128xi32>
      %86 = arith.cmpi eq, %14, %85 : vector<128x128xi32>
      %cst_36 = arith.constant 0.000000e+00 : f32
      %87 = vector.broadcast %cst_36 : f32 to vector<128x128xf32>
      %88 = arith.select %86, %36, %87 : vector<128x128xi1>, vector<128x128xf32>
      %cst_37 = arith.constant dense<0.000000e+00> : vector<128xf32>
      %89 = vector.multi_reduction <add>, %88, %cst_37 [1] : vector<128x128xf32> to vector<128xf32>
      %90 = vector.shape_cast %89 : vector<128xf32> to vector<128x1xf32>
      %91 = arith.addf %26, %84 : vector<128x1xf32>
      %cst_38 = arith.constant 9.99999996E-13 : f32
      %92 = vector.broadcast %cst_38 : f32 to vector<128x1xf32>
      %93 = arith.maximumf %91, %92 : vector<128x1xf32>
      %94 = math.sqrt %93 : vector<128x1xf32>
      %95 = arith.addf %26, %90 : vector<128x1xf32>
      %cst_39 = arith.constant 9.99999996E-13 : f32
      %96 = vector.broadcast %cst_39 : f32 to vector<128x1xf32>
      %97 = arith.maximumf %95, %96 : vector<128x1xf32>
      %98 = math.sqrt %97 : vector<128x1xf32>
      %99 = arith.subf %74, %78 : vector<128x1xf32>
      %cst_40 = arith.constant 3.000000e-01 : f32
      %100 = vector.broadcast %cst_40 : f32 to vector<128x1xf32>
      %101 = arith.addf %99, %100 : vector<128x1xf32>
      %cst_41 = arith.constant 0.000000e+00 : f32
      %102 = vector.broadcast %cst_41 : f32 to vector<128x1xf32>
      %103 = arith.maximumf %101, %102 : vector<128x1xf32>
      %104 = arith.subf %94, %98 : vector<128x1xf32>
      %cst_42 = arith.constant 3.000000e-01 : f32
      %105 = vector.broadcast %cst_42 : f32 to vector<128x1xf32>
      %106 = arith.addf %104, %105 : vector<128x1xf32>
      %cst_43 = arith.constant 0.000000e+00 : f32
      %107 = vector.broadcast %cst_43 : f32 to vector<128x1xf32>
      %108 = arith.maximumf %106, %107 : vector<128x1xf32>
      %109 = tpu.iota {dimensions = array<i32: 0>} : vector<128x1xi32>
      %c8_i32_44 = arith.constant 8 : i32
      %110 = vector.broadcast %c8_i32_44 : i32 to vector<128x1xi32>
      %111 = arith.cmpi slt, %109, %110 : vector<128x1xi32>
      %cst_45 = arith.constant 0.000000e+00 : f32
      %112 = vector.broadcast %cst_45 : f32 to vector<128x1xf32>
      %113 = arith.select %111, %103, %112 : vector<128x1xi1>, vector<128x1xf32>
      %cst_46 = arith.constant dense<0.000000e+00> : vector<1xf32>
      %114 = vector.multi_reduction <add>, %113, %cst_46 [0] : vector<128x1xf32> to vector<1xf32>
      %115 = vector.shape_cast %114 : vector<1xf32> to vector<1x1xf32>
      %cst_47 = arith.constant 1.250000e-01 : f32
      %116 = vector.broadcast %cst_47 : f32 to vector<1x1xf32>
      %117 = arith.mulf %115, %116 : vector<1x1xf32>
      %c0_48 = arith.constant 0 : index
      %c0_49 = arith.constant 0 : index
      %118 = vector.load %arg5[%c0_48, %c0_49] : memref<1x1xf32, #tpu.memory_space<vmem>>, vector<1x1xf32>
      tpu.vector_store %arg5[%c0_48, %c0_49], %117 {strides = array<i32>} : memref<1x1xf32, #tpu.memory_space<vmem>>, vector<1x1xf32>,
      %cst_50 = arith.constant 0.000000e+00 : f32
      %119 = vector.broadcast %cst_50 : f32 to vector<128x1xf32>
      %120 = arith.select %111, %108, %119 : vector<128x1xi1>, vector<128x1xf32>
      %cst_51 = arith.constant dense<0.000000e+00> : vector<1xf32>
      %121 = vector.multi_reduction <add>, %120, %cst_51 [0] : vector<128x1xf32> to vector<1xf32>
      %122 = vector.shape_cast %121 : vector<1xf32> to vector<1x1xf32>
      %cst_52 = arith.constant 1.250000e-01 : f32
      %123 = vector.broadcast %cst_52 : f32 to vector<1x1xf32>
      %124 = arith.mulf %122, %123 : vector<1x1xf32>
      %c0_53 = arith.constant 0 : index
      %c0_54 = arith.constant 0 : index
      %125 = vector.load %arg6[%c0_53, %c0_54] : memref<1x1xf32, #tpu.memory_space<vmem>>, vector<1x1xf32>
      tpu.vector_store %arg6[%c0_53, %c0_54], %124 {strides = array<i32>} : memref<1x1xf32, #tpu.memory_space<vmem>>, vector<1x1xf32>,
    } else {
    }
    return
  }
  func.func @transform_0(%arg0: i32) -> (i32, i32) {
    %c0_i32 = arith.constant 0 : i32
    %c0_i32_0 = arith.constant 0 : i32
    return %c0_i32, %arg0 : i32, i32
  }
  func.func @transform_1(%arg0: i32) -> (i32, i32) {
    %c0_i32 = arith.constant 0 : i32
    %c0_i32_0 = arith.constant 0 : i32
    %c0_i32_1 = arith.constant 0 : i32
    return %c0_i32, %c0_i32_0 : i32, i32
  }
  func.func @transform_2(%arg0: i32) -> (i32, i32) {
    %c0_i32 = arith.constant 0 : i32
    %c0_i32_0 = arith.constant 0 : i32
    %c0_i32_1 = arith.constant 0 : i32
    return %c0_i32, %c0_i32_0 : i32, i32
  }
  func.func @transform_3(%arg0: i32) -> (i32, i32) {
    %c0_i32 = arith.constant 0 : i32
    %c0_i32_0 = arith.constant 0 : i32
    %c0_i32_1 = arith.constant 0 : i32
    return %c0_i32, %c0_i32_0 : i32, i32
  }
  func.func @transform_4(%arg0: i32) -> (i32, i32) {
    %c0_i32 = arith.constant 0 : i32
    %c0_i32_0 = arith.constant 0 : i32
    %c0_i32_1 = arith.constant 0 : i32
    return %c0_i32, %c0_i32_0 : i32, i32
  }
  func.func @transform_5(%arg0: i32) -> (i32, i32) {
    %c0_i32 = arith.constant 0 : i32
    %c0_i32_0 = arith.constant 0 : i32
    %c0_i32_1 = arith.constant 0 : i32
    return %c0_i32, %c0_i32_0 : i32, i32
  }
}

</mosaic_0001>

<bundles_post_ra>
// kernel: tpu_custom_call.1
= control target key start
LH: loop header
LB: loop body
LE: loop exit
PB: predicated region body
PF: predicated region fallthrough
CT: control target
= control target key end

     0   :  { %11 = vsyncpa [#allocation4], 0  ;;  %vm37_vm0 = vcmask 261120   ;;  %v2796_v2 = vmov 0   ;;  %s3288_s0 = inlined_call_operand.vmem [shape: f32[128,32], index: 0, kind: input, shape index: {}]   ;;  %s3289_s1 = inlined_call_operand.vmem [shape: f32[128,16], index: 1, kind: input, shape index: {}]   ;;  %s3290_s2 = inlined_call_operand.vmem [shape: s32[128,1], index: 2, kind: input, shape index: {}]   ;;  %s3291_s3 = inlined_call_operand.vmem [shape: s32[1,128], index: 3, kind: input, shape index: {}]   ;;  %s3292_s4 = inlined_call_operand.hbm [shape: f32[1,1], index: 4, kind: output, shape index: {0}]   ;;  %s3293_s5 = inlined_call_operand.hbm [shape: f32[1,1], index: 5, kind: output, shape index: {1}]  }
   0x1   :  { %v2833_v0 = vld [vmem:[%s3288_s0 + $0x78] sm:$0xff]  ;;  %v2838_v1 = vld [vmem:[%s3288_s0 + $0x70] sm:$0xff]  ;;  %2743 = vset.pattern.permute.xlu0 %v2796_v2  ;;  %v34_v3 = vld [vmem:[%s3288_s0 + $0x68] sm:$0xff] }
   0x2   :  { %2627 = vmatprep.subr.msk.mxu0 %vm37_vm0, %v2833_v0  ;;  %v21_v4 = vld [vmem:[%s3288_s0] sm:$0xff] }
   0x3   :  { %2628 = vmatpush3.xpose.msk.msra.mxu0 %vm37_vm0, %v2833_v0  ;;  %v770_v5 = vld [vmem:[%s3290_s2] sm:$0xff] }
   0x4   :  { %2629 = vmatprep.subr.msk.mxu0 %vm37_vm0, %v2838_v1 }
   0x5   :  { %12 = vsyncpa [#allocation6], 0  ;;  %2659 = vmatprep.mubr.msk.f32.mxu0 %vm37_vm0, %v21_v4  ;;  %788 = vperm.xlu0 %2743, %v770_v5   ;;  %v33_v6 = vld [vmem:[%s3288_s0 + $0x60] sm:$0xff]  ;;  %v32_v7 = vld [vmem:[%s3288_s0 + $0x58] sm:$0xff]  ;;  %vm338_vm1 = vcmask 130048   ;;  %v532_v34 = vlaneseq }
   0x6   :  { %v31_v8 = vld [vmem:[%s3288_s0 + $0x50] sm:$0xff]  ;;  %v30_v9 = vld [vmem:[%s3288_s0 + $0x48] sm:$0xff]  ;;  %v29_v10 = vld [vmem:[%s3288_s0 + $0x40] sm:$0xff] }
   0x7   :  { %2630 = vmatpush3.xpose.msk.msra.mxu0 %vm37_vm0, %v2838_v1  ;;  %v28_v11 = vld [vmem:[%s3288_s0 + $0x38] sm:$0xff]  ;;  %v27_v12 = vld [vmem:[%s3288_s0 + $0x30] sm:$0xff]  ;;  %v26_v13 = vld [vmem:[%s3288_s0 + $0x28] sm:$0xff]  ;;  %v3044_v35 = vshrl.u32 %v532_v34, 7  ;;  %v3048_v36 = vand.u32 127, %v532_v34 }
   0x8   :  { %2631 = vmatprep.subr.msk.mxu0 %vm37_vm0, %v34_v3  ;;  %v25_v14 = vld [vmem:[%s3288_s0 + $0x20] sm:$0xff]  ;;  %v24_v15 = vld [vmem:[%s3288_s0 + $0x18] sm:$0xff]  ;;  %v23_v16 = vld [vmem:[%s3288_s0 + $0x10] sm:$0xff] }
   0x9   :  { %v22_v17 = vld [vmem:[%s3288_s0 + $0x8] sm:$0xff]  ;;  %v2942_v18 = vld [vmem:[%s3289_s1 + $0x78] sm:$0xff]  ;;  %v2947_v19 = vld [vmem:[%s3289_s1 + $0x70] sm:$0xff]  ;;  %v3051_v37 = vadd.s32 8, %v3044_v35  ;;  %vm551_vm2 = vcmp.eq.s32.totalorder %v3044_v35, %v3048_v36  ;;  %v3056_v39 = vadd.s32 16, %v3044_v35  ;;  %v3065_v41 = vadd.s32 24, %v3044_v35 }
   0xa   :  { %2683 = vmatprep.subr.msk.mxu1 %vm338_vm1, %v2942_v18  ;;  %v2958_v20 = vld [vmem:[%s3289_s1 + $0x68] sm:$0xff]  ;;  %v322_v21 = vld [vmem:[%s3289_s1] sm:$0xff]  ;;  %v2980_v23 = vld [vmem:[%s3289_s1 + $0x58] sm:$0xff]  ;;  %v3076_v44 = vadd.s32 32, %v3044_v35  ;;  %v3087_v48 = vadd.s32 40, %v3044_v35  ;;  %v3095_v52 = vadd.s32 48, %v3044_v35 }
   0xb   :  { %2632 = vmatpush3.xpose.msk.msra.mxu0 %vm37_vm0, %v34_v3  ;;  %2684 = vmatpush3.xpose.msk.msra.mxu1 %vm338_vm1, %v2942_v18  ;;  %v2971_v22 = vld [vmem:[%s3289_s1 + $0x60] sm:$0xff]  ;;  %v332_v24 = vld [vmem:[%s3289_s1 + $0x50] sm:$0xff]  ;;  %v331_v25 = vld [vmem:[%s3289_s1 + $0x48] sm:$0xff]  ;;  %vm552_vm3 = vcmp.eq.s32.totalorder %v3051_v37, %v3048_v36  ;;  %vm553_vm4 = vcmp.eq.s32.totalorder %v3056_v39, %v3048_v36  ;;  %vm554_vm5 = vcmp.eq.s32.totalorder %v3065_v41, %v3048_v36  ;;  %v3107_v56 = vadd.s32 56, %v3044_v35 }
   0xc   :  { %2633 = vmatprep.subr.msk.mxu0 %vm37_vm0, %v33_v6  ;;  %2685 = vmatprep.subr.msk.mxu1 %vm338_vm1, %v2947_v19  ;;  %v330_v26 = vld [vmem:[%s3289_s1 + $0x40] sm:$0xff]  ;;  %v329_v27 = vld [vmem:[%s3289_s1 + $0x38] sm:$0xff]  ;;  %v328_v28 = vld [vmem:[%s3289_s1 + $0x30] sm:$0xff]  ;;  %vm555_vm6 = vcmp.eq.s32.totalorder %v3076_v44, %v3048_v36  ;;  %vm556_vm7 = vcmp.eq.s32.totalorder %v3087_v48, %v3048_v36  ;;  %vm3303_vm8 = vcmp.eq.s32.totalorder %v3095_v52, %v3048_v36  ;;  %v3115_v60 = vadd.s32 64, %v3044_v35 }
   0xd   :  { %2715 = vmatprep.mubr.msk.f32.mxu1 %vm338_vm1, %v322_v21  ;;  %v327_v29 = vld [vmem:[%s3289_s1 + $0x28] sm:$0xff]  ;;  %v326_v30 = vld [vmem:[%s3289_s1 + $0x20] sm:$0xff]  ;;  %v325_v31 = vld [vmem:[%s3289_s1 + $0x18] sm:$0xff]  ;;  %vm3302_vm9 = vcmp.eq.s32.totalorder %v3107_v56, %v3048_v36 }
   0xe   :  { %v324_v32 = vld [vmem:[%s3289_s1 + $0x10] sm:$0xff]  ;;  %v323_v33 = vld [vmem:[%s3289_s1 + $0x8] sm:$0xff]  ;;  %vm3301_vm10 = vcmp.eq.s32.totalorder %v3115_v60, %v3048_v36 }
   0xf   :  { %2634 = vmatpush3.xpose.msk.msra.mxu0 %vm37_vm0, %v33_v6  ;;  %2686 = vmatpush3.xpose.msk.msra.mxu1 %vm338_vm1, %v2947_v19 }
  0x10   :  { %2635 = vmatprep.subr.msk.mxu0 %vm37_vm0, %v32_v7  ;;  %2687 = vmatprep.subr.msk.mxu1 %vm338_vm1, %v2958_v20 }
  0x13   :  { %2636 = vmatpush3.xpose.msk.msra.mxu0 %vm37_vm0, %v32_v7  ;;  %2688 = vmatpush3.xpose.msk.msra.mxu1 %vm338_vm1, %v2958_v20 }
  0x14   :  { %2637 = vmatprep.subr.msk.mxu0 %vm37_vm0, %v31_v8  ;;  %2689 = vmatprep.subr.msk.mxu1 %vm338_vm1, %v2971_v22 }
  0x17   :  { %2638 = vmatpush3.xpose.msk.msra.mxu0 %vm37_vm0, %v31_v8  ;;  %2690 = vmatpush3.xpose.msk.msra.mxu1 %vm338_vm1, %v2971_v22 }
  0x18   :  { %2639 = vmatprep.subr.msk.mxu0 %vm37_vm0, %v30_v9  ;;  %2691 = vmatprep.subr.msk.mxu1 %vm338_vm1, %v2980_v23 }
  0x1b   :  { %2640 = vmatpush3.xpose.msk.msra.mxu0 %vm37_vm0, %v30_v9  ;;  %2692 = vmatpush3.xpose.msk.msra.mxu1 %vm338_vm1, %v2980_v23 }
  0x1c   :  { %2641 = vmatprep.subr.msk.mxu0 %vm37_vm0, %v29_v10  ;;  %2693 = vmatprep.subr.msk.mxu1 %vm338_vm1, %v332_v24 }
  0x1f   :  { %2642 = vmatpush3.xpose.msk.msra.mxu0 %vm37_vm0, %v29_v10  ;;  %2694 = vmatpush3.xpose.msk.msra.mxu1 %vm338_vm1, %v332_v24 }
  0x20   :  { %2643 = vmatprep.subr.msk.mxu0 %vm37_vm0, %v28_v11  ;;  %2695 = vmatprep.subr.msk.mxu1 %vm338_vm1, %v331_v25 }
  0x23   :  { %2644 = vmatpush3.xpose.msk.msra.mxu0 %vm37_vm0, %v28_v11  ;;  %2696 = vmatpush3.xpose.msk.msra.mxu1 %vm338_vm1, %v331_v25 }
  0x24   :  { %2645 = vmatprep.subr.msk.mxu0 %vm37_vm0, %v27_v12  ;;  %2697 = vmatprep.subr.msk.mxu1 %vm338_vm1, %v330_v26 }
  0x27   :  { %2646 = vmatpush3.xpose.msk.msra.mxu0 %vm37_vm0, %v27_v12  ;;  %2698 = vmatpush3.xpose.msk.msra.mxu1 %vm338_vm1, %v330_v26 }
  0x28   :  { %2647 = vmatprep.subr.msk.mxu0 %vm37_vm0, %v26_v13  ;;  %2699 = vmatprep.subr.msk.mxu1 %vm338_vm1, %v329_v27 }
  0x2b   :  { %2648 = vmatpush3.xpose.msk.msra.mxu0 %vm37_vm0, %v26_v13  ;;  %2700 = vmatpush3.xpose.msk.msra.mxu1 %vm338_vm1, %v329_v27 }
  0x2c   :  { %2649 = vmatprep.subr.msk.mxu0 %vm37_vm0, %v25_v14  ;;  %2701 = vmatprep.subr.msk.mxu1 %vm338_vm1, %v328_v28 }
  0x2f   :  { %2650 = vmatpush3.xpose.msk.msra.mxu0 %vm37_vm0, %v25_v14  ;;  %2702 = vmatpush3.xpose.msk.msra.mxu1 %vm338_vm1, %v328_v28 }
  0x30   :  { %2651 = vmatprep.subr.msk.mxu0 %vm37_vm0, %v24_v15  ;;  %2703 = vmatprep.subr.msk.mxu1 %vm338_vm1, %v327_v29 }
  0x33   :  { %2652 = vmatpush3.xpose.msk.msra.mxu0 %vm37_vm0, %v24_v15  ;;  %2704 = vmatpush3.xpose.msk.msra.mxu1 %vm338_vm1, %v327_v29 }
  0x34   :  { %2653 = vmatprep.subr.msk.mxu0 %vm37_vm0, %v23_v16  ;;  %2705 = vmatprep.subr.msk.mxu1 %vm338_vm1, %v326_v30 }
  0x37   :  { %2654 = vmatpush3.xpose.msk.msra.mxu0 %vm37_vm0, %v23_v16  ;;  %2706 = vmatpush3.xpose.msk.msra.mxu1 %vm338_vm1, %v326_v30 }
  0x38   :  { %2655 = vmatprep.subr.msk.mxu0 %vm37_vm0, %v22_v17  ;;  %2707 = vmatprep.subr.msk.mxu1 %vm338_vm1, %v325_v31 }
  0x3b   :  { %2656 = vmatpush3.xpose.msk.msra.mxu0 %vm37_vm0, %v22_v17  ;;  %2708 = vmatpush3.xpose.msk.msra.mxu1 %vm338_vm1, %v325_v31 }
  0x3c   :  { %2657 = vmatprep.subr.msk.mxu0 %vm37_vm0, %v21_v4  ;;  %2709 = vmatprep.subr.msk.mxu1 %vm338_vm1, %v324_v32 }
  0x3f   :  { %2658 = vmatpush3.xpose.msk.msra.mxu0 %vm37_vm0, %v21_v4  ;;  %2710 = vmatpush3.xpose.msk.msra.mxu1 %vm338_vm1, %v324_v32  ;;  %v3135_v4 = vadd.s32 80, %v3044_v35 }
  0x40   :  { %2711 = vmatprep.subr.msk.mxu1 %vm338_vm1, %v323_v33 }
  0x41   :  { %vm3298_vm12 = vcmp.eq.s32.totalorder %v3135_v4, %v3048_v36 }
  0x42   :  { %2660 = vmatmul.mubr.msk.f32.vlgmr.msra.gmra.mxu0 %vm37_vm0, %v22_v17 }
  0x43   :  { %2662 = vmatprep.mubr.msk.f32.mxu0 %vm37_vm0, %v23_v16  ;;  %2712 = vmatpush3.xpose.msk.msra.mxu1 %vm338_vm1, %v323_v33  ;;  %v3161_v16 = vadd.s32 104, %v3044_v35 }
  0x44   :  { %2713 = vmatprep.subr.msk.mxu1 %vm338_vm1, %v322_v21 }
  0x45   :  { %vm3294_vm15 = vcmp.eq.s32.totalorder %v3161_v16, %v3048_v36 }
  0x46   :  { %2663 = vmatmul.mubr.msk.f32.gmra.mxu0 %vm37_vm0, %v24_v15 }
  0x47   :  { %2665 = vmatprep.mubr.msk.f32.mxu0 %vm37_vm0, %v25_v14  ;;  %2714 = vmatpush3.xpose.msk.msra.mxu1 %vm338_vm1, %v322_v21 }
  0x4a   :  { %2666 = vmatmul.mubr.msk.f32.gmra.mxu0 %vm37_vm0, %v26_v13  ;;  %2716 = vmatmul.mubr.msk.f32.vlgmr.msra.gmra.mxu1 %vm338_vm1, %v323_v33 }
  0x4b   :  { %2668 = vmatprep.mubr.msk.f32.mxu0 %vm37_vm0, %v27_v12  ;;  %2718 = vmatprep.mubr.msk.f32.mxu1 %vm338_vm1, %v324_v32  ;;  %v3153_v12 = vadd.s32 96, %v3044_v35 }
  0x4d   :  { %vm3295_vm14 = vcmp.eq.s32.totalorder %v3153_v12, %v3048_v36 }
  0x4e   :  { %2669 = vmatmul.mubr.msk.f32.gmra.mxu0 %vm37_vm0, %v28_v11  ;;  %2719 = vmatmul.mubr.msk.f32.gmra.mxu1 %vm338_vm1, %v325_v31 }
  0x4f   :  { %2671 = vmatprep.mubr.msk.f32.mxu0 %vm37_vm0, %v29_v10  ;;  %2721 = vmatprep.mubr.msk.f32.mxu1 %vm338_vm1, %v326_v30 }
  0x52   :  { %2672 = vmatmul.mubr.msk.f32.gmra.mxu0 %vm37_vm0, %v30_v9  ;;  %2722 = vmatmul.mubr.msk.f32.gmra.mxu1 %vm338_vm1, %v327_v29 }
  0x53   :  { %2674 = vmatprep.mubr.msk.f32.mxu0 %vm37_vm0, %v31_v8  ;;  %2724 = vmatprep.mubr.msk.f32.mxu1 %vm338_vm1, %v328_v28  ;;  %v3145_v8 = vadd.s32 88, %v3044_v35 }
  0x55   :  { %vm3297_vm13 = vcmp.eq.s32.totalorder %v3145_v8, %v3048_v36 }
  0x56   :  { %2675 = vmatmul.mubr.msk.f32.gmra.mxu0 %vm37_vm0, %v32_v7  ;;  %2725 = vmatmul.mubr.msk.f32.gmra.mxu1 %vm338_vm1, %v329_v27 }
  0x57   :  { %2677 = vmatprep.mubr.msk.f32.mxu0 %vm37_vm0, %v33_v6  ;;  %2727 = vmatprep.mubr.msk.f32.mxu1 %vm338_vm1, %v330_v26 }
  0x5a   :  { %2678 = vmatmul.mubr.msk.f32.gmra.mxu0 %vm37_vm0, %v34_v3  ;;  %2728 = vmatmul.mubr.msk.f32.gmra.mxu1 %vm338_vm1, %v331_v25 }
  0x5b   :  { %2680 = vmatprep.mubr.msk.f32.mxu0 %vm37_vm0, %v2838_v1  ;;  %2730 = vmatprep.mubr.msk.f32.mxu1 %vm338_vm1, %v332_v24  ;;  %v3177_v24 = vadd.s32 120, %v3044_v35 }
  0x5e   :  { %2681 = vmatmul.mubr.msk.f32.gmra.mxu0 %vm37_vm0, %v2833_v0  ;;  %2731 = vmatmul.mubr.msk.f32.gmra.mxu1 %vm338_vm1, %v2980_v23  ;;  %v3127_v0 = vadd.s32 72, %v3044_v35 }
  0x5f   :  { %2733 = vmatprep.mubr.msk.f32.mxu1 %vm338_vm1, %v2971_v22 }
  0x60   :  { %vm3300_vm11 = vcmp.eq.s32.totalorder %v3127_v0, %v3048_v36 }
  0x62   :  { %2734 = vmatmul.mubr.msk.f32.gmra.mxu1 %vm338_vm1, %v2958_v20  ;;  %v3169_v20 = vadd.s32 112, %v3044_v35 }
  0x63   :  { %2736 = vmatprep.mubr.msk.f32.mxu1 %vm338_vm1, %v2947_v19 }
  0x64   :  { %vm3296_vm0 = vcmp.eq.s32.totalorder %v3169_v20, %v3048_v36 }
  0x66   :  { %2737 = vmatmul.mubr.msk.f32.gmra.mxu1 %vm338_vm1, %v2942_v18  ;;  %vm3299_vm1 = vcmp.eq.s32.totalorder %v3177_v24, %v3048_v36 }
 0x102   :  { %v2661_v38 = vpop.f32.mrf.mxu0 }
 0x103   :  { %v568_v45 = vsel %vm552_vm3, %v2661_v38, 0.0 }
 0x104   :  { %v3062_v40 = vpop.f32.mrf.mxu0 }
 0x105   :  { %v3071_v42 = vsel %vm551_vm2, %v3062_v40, 0.0 }
 0x106   :  { %v2664_v43 = vpop.f32.mrf.mxu0  ;;  %v631_v46 = vadd.f32 %v568_v45, %v3071_v42  ;;  %v789_v45 = vpop.permute.xlu0 %788 }
 0x107   :  { %v570_v53 = vsel %vm554_vm5, %v2664_v43, 0.0  ;;  %v2562_v43 = vld [vmem:[%s3291_s3] ss:$0 sm:$0xff]  ;;  %s2798_s3 = smov [#allocation3]  }
 0x108   :  { %v162_v47 = vpop.f32.mrf.mxu0  ;;  %s2476_s6 = sshll.u32 %s2798_s3, 4  ;;  %s2477_s6 = int_to_ptr.vmem [resolvable:$true] %s2476_s6 }
 0x109   :  { %v569_v49 = vsel %vm553_vm4, %v162_v47, 0.0  ;;  %s2752_s2 = scalar_lea.vmem %s2477_s6, 16  ;;  %s2756_s7 = scalar_lea.vmem %s2477_s6, 32 }
 0x10a   :  { %v632_v50 = vadd.f32 %v631_v46, %v569_v49  ;;  %v2667_v51 = vpop.f32.mrf.mxu0  ;;  %p2753_p0 = scmp.ne.s32.totalorder %s2477_s6, %s2752_s2  ;;  %p2757_p1 = scmp.lt.s32.totalorder %s2477_s6, %s2477_s6 }
 0x10b   :  { %v572_v61 = vsel %vm556_vm7, %v2667_v51, 0.0  ;;  %v705_v51 = vmul.f32 2.0, %v3062_v40  ;;  %p2758_p2 = scmp.lt.s32.totalorder %s2756_s7, %s2752_s2 }
 0x10c   :  { %v172_v54 = vpop.f32.mrf.mxu0  ;;  %v633_v55 = vadd.f32 %v632_v50, %v570_v53 }
 0x10d   :  { %v571_v57 = vsel %vm555_vm6, %v172_v54, 0.0  ;;  %p2759_p3 = por %p2758_p2, %p2757_p1 }
 0x10e   :  { %v634_v58 = vadd.f32 %v633_v55, %v571_v57  ;;  %v2670_v59 = vpop.f32.mrf.mxu0 }
 0x10f   :  { %v574_v5 = vsel %vm3302_vm9, %v2670_v59, 0.0  ;;  %p2760_p4 = pnand %p2759_p3, %p2753_p0 }
 0x110   :  { %v182_v62 = vpop.f32.mrf.mxu0  ;;  %v635_v63 = vadd.f32 %v634_v58, %v572_v61 }
 0x111   :  { %v573_v1 = vsel %vm3303_vm8, %v182_v62, 0.0 }
 0x112   :  { %v636_v2 = vadd.f32 %v635_v63, %v573_v1  ;;  %v2673_v3 = vpop.f32.mrf.mxu0 }
 0x113   :  { %v576_v13 = vsel %vm3300_vm11, %v2673_v3, 0.0  ;;  %v2717_v3 = vpop.f32.mrf.mxu1 }
 0x114   :  { %v192_v6 = vpop.f32.mrf.mxu0  ;;  %v637_v7 = vadd.f32 %v636_v2, %v574_v5 }
 0x115   :  { %v575_v9 = vsel %vm3301_vm10, %v192_v6, 0.0  ;;  %v453_v5 = vpop.f32.mrf.mxu1 }
 0x116   :  { %v638_v10 = vadd.f32 %v637_v7, %v575_v9  ;;  %v2676_v11 = vpop.f32.mrf.mxu0 }
 0x117   :  { %v578_v21 = vsel %vm3297_vm13, %v2676_v11, 0.0  ;;  %v2720_v6 = vpop.f32.mrf.mxu1  ;;  %v583_v11 = vsel %vm551_vm2, %v453_v5, 0.0 }
 0x118   :  { %v202_v14 = vpop.f32.mrf.mxu0  ;;  %v639_v15 = vadd.f32 %v638_v10, %v576_v13  ;;  %v584_v10 = vsel %vm552_vm3, %v2717_v3, 0.0  ;;  %vm3305_vm3 = vcmp.eq.s32.totalorder %v3107_v56, %v3048_v36 }
 0x119   :  { %v577_v17 = vsel %vm3298_vm12, %v202_v14, 0.0  ;;  %vm769_vm12 = vcmp.lt.s32.totalorder %v3048_v36, 8  ;;  %v463_v7 = vpop.f32.mrf.mxu1  ;;  %v684_v14 = vadd.f32 %v584_v10, %v583_v11 }
 0x11a   :  { %v640_v18 = vadd.f32 %v639_v15, %v577_v17  ;;  %v2679_v19 = vpop.f32.mrf.mxu0  ;;  %v585_v15 = vsel %vm553_vm4, %v463_v7, 0.0  ;;  %vm3306_vm4 = vcmp.eq.s32.totalorder %v3115_v60, %v3048_v36 }
 0x11b   :  { %v580_v28 = vsel %vm3294_vm15, %v2679_v19, 0.0  ;;  %vm839_vm15 = vcmp.eq.s32.totalorder %v789_v45, %v2562_v43  ;;  %v2723_v9 = vpop.f32.mrf.mxu1  ;;  %v586_v19 = vsel %vm554_vm5, %v2720_v6, 0.0  ;;  %vm3307_vm5 = vcmp.eq.s32.totalorder %v3127_v0, %v3048_v36 }
 0x11c   :  { %v212_v22 = vpop.f32.mrf.mxu0  ;;  %v641_v23 = vadd.f32 %v640_v18, %v578_v21  ;;  %v685_v18 = vadd.f32 %v684_v14, %v585_v15 }
 0x11d   :  { %v579_v25 = vsel %vm3295_vm14, %v212_v22, 0.0  ;;  %vm2797_vm14 = vmmov 1   ;;  %v473_v13 = vpop.f32.mrf.mxu1 }
 0x11e   :  { %v642_v26 = vadd.f32 %v641_v23, %v579_v25  ;;  %v2682_v27 = vpop.f32.mrf.mxu0  ;;  %vm903_vm13 = vmxor %vm839_vm15, %vm2797_vm14  ;;  %v686_v22 = vadd.f32 %v685_v18, %v586_v19  ;;  %v587_v37 = vsel %vm555_vm6, %v473_v13, 0.0  ;;  %v588_v25 = vsel %vm556_vm7, %v2723_v9, 0.0 }
 0x11f   :  { %v582_v33 = vsel %vm3299_vm1, %v2682_v27, 0.0  ;;  %vm919_vm11 = vmand %vm903_vm13, %vm769_vm12  ;;  %v2726_v17 = vpop.f32.mrf.mxu1  ;;  %vm3308_vm6 = vcmp.eq.s32.totalorder %v3135_v4, %v3048_v36  ;;  %vm3309_vm7 = vcmp.eq.s32.totalorder %v3145_v8, %v3048_v36 }
 0x120   :  { %v222_v29 = vpop.f32.mrf.mxu0  ;;  %v643_v30 = vadd.f32 %v642_v26, %v580_v28  ;;  %v687_v23 = vadd.f32 %v686_v22, %v587_v37 }
 0x121   :  { %v581_v31 = vsel %vm3296_vm0, %v222_v29, 0.0  ;;  %vm855_vm0 = vmxor %vm551_vm2, %vm2797_vm14  ;;  %v483_v21 = vpop.f32.mrf.mxu1  ;;  %vm3304_vm2 = vcmp.eq.s32.totalorder %v3095_v52, %v3048_v36  ;;  %v590_v29 = vsel %vm3305_vm3, %v2726_v17, 0.0 }
 0x122   :  { %v644_v32 = vadd.f32 %v643_v30, %v581_v31  ;;  %vm871_vm1 = vmand %vm839_vm15, %vm855_vm0  ;;  %v688_v26 = vadd.f32 %v687_v23, %v588_v25  ;;  %v589_v27 = vsel %vm3304_vm2, %v483_v21, 0.0 }
 0x123   :  { %vm887_vm10 = vmand %vm871_vm1, %vm769_vm12  ;;  %v2729_v35 = vpop.f32.mrf.mxu1 }
 0x124   :  { %v645_v34 = vadd.f32 %v644_v32, %v582_v33  ;;  %v689_v28 = vadd.f32 %v688_v26, %v589_v27  ;;  %v592_v33 = vsel %vm3307_vm5, %v2729_v35, 0.0 }
 0x125   :  { %v493_v39 = vpop.f32.mrf.mxu1 }
 0x126   :  { %v646_v38 = vrot.slane %v645_v34, 4  ;;  %v690_v30 = vadd.f32 %v689_v28, %v590_v29  ;;  %v591_v31 = vsel %vm3306_vm4, %v493_v39, 0.0  ;;  %vm2429_vm4 = vcmask 0  }
 0x127   :  { %v2732_v41 = vpop.f32.mrf.mxu1 }
 0x128   :  { %v647_v46 = vadd.f32 %v646_v38, %v645_v34  ;;  %v691_v32 = vadd.f32 %v690_v30, %v591_v31  ;;  %v594_v45 = vsel %vm3309_vm7, %v2732_v41, 0.0 }
 0x129   :  { %v503_v44 = vpop.f32.mrf.mxu1 }
 0x12a   :  { %v648_v47 = vrot.slane %v647_v46, 2  ;;  %v692_v34 = vadd.f32 %v691_v32, %v592_v33  ;;  %v593_v38 = vsel %vm3308_vm6, %v503_v44, 0.0 }
 0x12b   :  { %v2735_v48 = vpop.f32.mrf.mxu1 }
 0x12c   :  { %v649_v49 = vadd.f32 %v648_v47, %v647_v46  ;;  %v693_v43 = vadd.f32 %v692_v34, %v593_v38 }
 0x12d   :  { %v513_v52 = vpop.f32.mrf.mxu1 }
 0x12e   :  { %v650_v50 = vrot.slane %v649_v49, 1  ;;  %v694_v47 = vadd.f32 %v693_v43, %v594_v45 }
 0x12f   :  { %v2738_v56 = vpop.f32.mrf.mxu1 }
 0x130   :  { %v651_v53 = vadd.f32 %v650_v50, %v649_v49 }
 0x131   :  { %v523_v46 = vpop.f32.mrf.mxu1 }
 0x132   :  { %v721_v54 = vsub.f32 %v651_v53, %v705_v51 }
 0x134   :  { %v983_v55 = vsel %vm919_vm11, %v721_v54, 1e+30  ;;  %v935_v57 = vsel %vm887_vm10, %v721_v54, -1e+30 }
 0x135   :  { %999 = vmin.xlane.f32.xlu1 %v983_v55  ;;  %951 = vmax.xlane.f32.xlu0 %v935_v57 }
 0x1be   :  { %v3203_v58 = vpop.xlane.xlu1 %999  ;;  %v3205_v59 = vpop.xlane.xlu0 %951 }
 0x1bf   :  { %vm1303_vm14 = vcmp.eq.f32.partialorder %v721_v54, %v3203_v58  ;;  %vm1031_vm9 = vcmp.eq.f32.partialorder %v721_v54, %v3205_v59 }
 0x1c0   :  { %vm1319_vm8 = vmand %vm919_vm11, %vm1303_vm14  ;;  %vm3313_vm11 = vcmp.eq.s32.totalorder %v3177_v24, %v3048_v36 }
 0x1c1   :  { %vm1047_vm15 = vmand %vm887_vm10, %vm1031_vm9  ;;  %v3213_v61 = vsel %vm1319_vm8, %v3048_v36, 128  ;;  %vm3310_vm8 = vcmp.eq.s32.totalorder %v3153_v12, %v3048_v36  ;;  %vm3311_vm9 = vcmp.eq.s32.totalorder %v3161_v16, %v3048_v36  ;;  %vm3312_vm10 = vcmp.eq.s32.totalorder %v3169_v20, %v3048_v36 }
 0x1c2   :  { %v3210_v40 = vsel %vm1047_vm15, %v3048_v36, 128  ;;  %v1352_v1 = vshra.s32 %v3213_v61, 16  ;;  %v595_v60 = vsel %vm3310_vm8, %v513_v52, 0.0  ;;  %v596_v0 = vsel %vm3311_vm9, %v2735_v48, 0.0 }
 0x1c3   :  { %v1080_v62 = vshra.s32 %v3210_v40, 16  ;;  %v695_v49 = vadd.f32 %v694_v47, %v595_v60  ;;  %v597_v4 = vsel %vm3312_vm10, %v523_v46, 0.0  ;;  %v598_v8 = vsel %vm3313_vm11, %v2738_v56, 0.0 }
 0x1c4   :  { %v3220_v2 = vcvt.s32.f32 %v1352_v1  ;;  %v1079_v6 = vand.u32 65535, %v3210_v40  ;;  %v1351_v9 = vand.u32 65535, %v3213_v61 }
 0x1c5   :  { %v3216_v63 = vcvt.s32.f32 %v1080_v62  ;;  %v696_v50 = vadd.f32 %v695_v49, %v596_v0  ;;  %v737_v62 = vmul.f32 2.0, %v453_v5 }
 0x1c6   :  { %v1081_v20 = vcvt.s32.f32 %v1079_v6  ;;  %v1353_v13 = vcvt.s32.f32 %v1351_v9 }
 0x1c7   :  { %1083 = vmin.xlane.f32.xlu1 %v3216_v63  ;;  %v697_v51 = vadd.f32 %v696_v50, %v597_v4 }
 0x1c9   :  { %v698_v53 = vadd.f32 %v697_v51, %v598_v8 }
 0x1cb   :  { %1355 = vmin.xlane.f32.xlu1 %v3220_v2  ;;  %v699_v12 = vrot.slane %v698_v53, 4 }
 0x1cd   :  { %v700_v54 = vadd.f32 %v699_v12, %v698_v53 }
 0x1cf   :  { %v701_v55 = vrot.slane %v700_v54, 2 }
 0x1d1   :  { %v702_v57 = vadd.f32 %v701_v55, %v700_v54 }
 0x1d3   :  { %v703_v1 = vrot.slane %v702_v57, 1 }
 0x1d5   :  { %v704_v16 = vadd.f32 %v703_v1, %v702_v57 }
 0x1d7   :  { %v753_v3 = vsub.f32 %v704_v16, %v737_v62 }
 0x250   :  { %v1084_v7 = vpop.xlane.xlu1 %1083 }
 0x251   :  { %vm1085_vm12 = vcmp.eq.f32.partialorder %v3216_v63, %v1084_v7  ;;  %v1090_v5 = vcvt.f32.s32 %v1084_v7 }
 0x252   :  { %v1086_v24 = vsel %vm1085_vm12, %v1081_v20, inf }
 0x253   :  { %1087 = vmin.xlane.f32.xlu1 %v1086_v24  ;;  %v1091_v40 = vshll.u32 %v1090_v5, 16 }
 0x254   :  { %v1356_v10 = vpop.xlane.xlu1 %1355 }
 0x255   :  { %vm1357_vm13 = vcmp.eq.f32.partialorder %v3220_v2, %v1356_v10  ;;  %v1362_v17 = vcvt.f32.s32 %v1356_v10 }
 0x256   :  { %v1358_v14 = vsel %vm1357_vm13, %v1353_v13, inf }
 0x257   :  { %1359 = vmin.xlane.f32.xlu1 %v1358_v14  ;;  %v1363_v21 = vshll.u32 %v1362_v17, 16 }
 0x25b   :  { %599 = vadd.xlane.f32.xlu1 %v3071_v42 }
 0x25f   :  { %652 = vadd.xlane.f32.xlu1 %v583_v11 }
 0x2dc   :  { %v1088_v15 = vpop.xlane.xlu1 %1087 }
 0x2dd   :  { %v1089_v18 = vcvt.f32.s32 %v1088_v15 }
 0x2df   :  { %v1092_v19 = vadd.s32 %v1091_v40, %v1089_v18 }
 0x2e0   :  { %v1360_v61 = vpop.xlane.xlu1 %1359 }
 0x2e1   :  { %v1361_v63 = vcvt.f32.s32 %v1360_v61  ;;  %vm1863_vm0 = vcmp.eq.s32.totalorder %v3048_v36, %v1092_v19 }
 0x2e2   :  { %v1879_v22 = vsel %vm1863_vm0, %v753_v3, 0.0 }
 0x2e3   :  { %v1364_v37 = vadd.s32 %v1363_v21, %v1361_v63  ;;  %1895 = vadd.xlane.f32.xlu1 %v1879_v22 }
 0x2e4   :  { %v600_v2 = vpop.xlane.xlu1 %599 }
 0x2e5   :  { %v1575_v35 = vadd.f32 %v3205_v59, %v600_v2  ;;  %v1719_v42 = vadd.f32 %v3203_v58, %v600_v2  ;;  %vm1927_vm1 = vcmp.eq.s32.totalorder %v3048_v36, %v1364_v37 }
 0x2e6   :  { %v1943_v11 = vsel %vm1927_vm1, %v753_v3, 0.0 }
 0x2e7   :  { %v1591_v23 = vmax.f32 %v1575_v35, 1e-12  ;;  %v1735_v25 = vmax.f32 %v1719_v42, 1e-12  ;;  %1959 = vadd.xlane.f32.xlu1 %v1943_v11 }
 0x2e9   :  { %2744 = vrsqrt.f32 %v1591_v23  ;;  %vm1609_vm14 = vcmp.eq.f32.partialorder %v1591_v23, inf  ;;  %v1612_v41 = vand.u32 2147483648, %v1591_v23  ;;  %vm1611_vm15 = vcmp.eq.f32.partialorder %v1591_v23, 0.0 }
 0x2ea   :  { %2746 = vrsqrt.f32 %v1735_v25  ;;  %vm1753_vm2 = vcmp.eq.f32.partialorder %v1735_v25, inf  ;;  %v1756_v59 = vand.u32 2147483648, %v1735_v25  ;;  %vm1755_vm3 = vcmp.eq.f32.partialorder %v1735_v25, 0.0 }
 0x2f6   :  { %v2745_v39 = vpop.eup %2744 }
 0x2f7   :  { %v2747_v26 = vpop.eup %2746  ;;  %v1608_v27 = vmul.f32 %v2745_v39, %v1591_v23 }
 0x2f8   :  { %v1752_v28 = vmul.f32 %v2747_v26, %v1735_v25 }
 0x2f9   :  { %v1610_v29 = vsel %vm1609_vm14, %v1591_v23, %v1608_v27 }
 0x2fa   :  { %v1613_v44 = vsel %vm1611_vm15, %v1612_v41, %v1610_v29  ;;  %v1754_v58 = vsel %vm1753_vm2, %v1735_v25, %v1752_v28 }
 0x2fb   :  { %v1757_v36 = vsel %vm1755_vm3, %v1756_v59, %v1754_v58 }
 0x2fc   :  { %v2279_v30 = vsub.f32 %v1613_v44, %v1757_v36 }
 0x2fe   :  { %v2295_v31 = vadd.f32 0.3, %v2279_v30 }
 0x300   :  { %v2311_v48 = vmax.f32 %v2295_v31, 0.0 }
 0x302   :  { %v2422_v32 = vrot.slane %v2311_v48, 4 }
 0x304   :  { %v2423_v33 = vadd.f32 %v2422_v32, %v2311_v48 }
 0x306   :  { %v2424_v52 = vrot.slane %v2423_v33, 2 }
 0x308   :  { %v2425_v34 = vadd.f32 %v2424_v52, %v2423_v33 }
 0x30a   :  { %v2426_v38 = vrot.slane %v2425_v34, 1 }
 0x30c   :  { %v2427_v56 = vadd.f32 %v2426_v38, %v2425_v34 }
 0x30e   :  { %v2428_v43 = vmul.f32 0.125, %v2427_v56 }
 0x310   :  { %2430 = vst.msk [vmem:[#allocation3] sm:$0x1] %vm2429_vm4, %v2428_v43 }
 0x311   :  { %2763 = shalt.err (!%p2760_p4)
}
 0x312   :  { %2479 = dma.vmem_to_hbm [thread:$0]  %s2477_s6, 16, %s3292_s4, [#allocation4]   ;;  %v653_v45 = vpop.xlane.xlu1 %652 }
 0x313   :  { %s2799_s4 = smov [#allocation5]  }
 0x314   :  { %s2486_s10 = sshll.u32 %s2799_s4, 4  ;;  %s2487_s10 = int_to_ptr.vmem [resolvable:$true] %s2486_s10 }
 0x315   :  { %s2772_s11 = scalar_lea.vmem %s2487_s10, 16  ;;  %s2776_s12 = scalar_lea.vmem %s2487_s10, 32 }
 0x316   :  { %p2773_p5 = scmp.ne.s32.totalorder %s2487_s10, %s2772_s11  ;;  %p2777_p6 = scmp.lt.s32.totalorder %s2487_s10, %s2487_s10 }
 0x317   :  { %p2778_p7 = scmp.lt.s32.totalorder %s2776_s12, %s2772_s11 }
 0x319   :  { %p2779_p8 = por %p2778_p7, %p2777_p6 }
 0x31b   :  { %p2780_p9 = pnand %p2779_p8, %p2773_p5 }
 0x36c   :  { %v1896_v60 = vpop.xlane.xlu1 %1895 }
 0x36d   :  { %v1991_v46 = vadd.f32 %v1896_v60, %v653_v45 }
 0x36f   :  { %v2007_v47 = vmax.f32 %v1991_v46, 1e-12 }
 0x370   :  { %v1960_v0 = vpop.xlane.xlu1 %1959 }
 0x371   :  { %2748 = vrsqrt.f32 %v2007_v47  ;;  %v2135_v49 = vadd.f32 %v1960_v0, %v653_v45  ;;  %vm2025_vm5 = vcmp.eq.f32.partialorder %v2007_v47, inf  ;;  %v2028_v54 = vand.u32 2147483648, %v2007_v47 }
 0x372   :  { %vm2027_vm7 = vcmp.eq.f32.partialorder %v2007_v47, 0.0 }
 0x373   :  { %v2151_v4 = vmax.f32 %v2135_v49, 1e-12 }
 0x375   :  { %2750 = vrsqrt.f32 %v2151_v4  ;;  %vm2169_vm6 = vcmp.eq.f32.partialorder %v2151_v4, inf  ;;  %v2172_v55 = vand.u32 2147483648, %v2151_v4  ;;  %vm2171_vm8 = vcmp.eq.f32.partialorder %v2151_v4, 0.0 }
 0x37e   :  { %v2749_v50 = vpop.eup %2748 }
 0x37f   :  { %v2024_v8 = vmul.f32 %v2749_v50, %v2007_v47 }
 0x381   :  { %v2026_v53 = vsel %vm2025_vm5, %v2007_v47, %v2024_v8 }
 0x382   :  { %v2751_v51 = vpop.eup %2750  ;;  %v2029_v62 = vsel %vm2027_vm7, %v2028_v54, %v2026_v53 }
 0x383   :  { %v2168_v12 = vmul.f32 %v2751_v51, %v2151_v4 }
 0x385   :  { %v2170_v57 = vsel %vm2169_vm6, %v2151_v4, %v2168_v12 }
 0x386   :  { %v2173_v1 = vsel %vm2171_vm8, %v2172_v55, %v2170_v57 }
 0x387   :  { %v2327_v16 = vsub.f32 %v2029_v62, %v2173_v1 }
 0x389   :  { %v2343_v3 = vadd.f32 0.3, %v2327_v16 }
 0x38b   :  { %v2359_v6 = vmax.f32 %v2343_v3, 0.0 }
 0x38d   :  { %v2462_v7 = vrot.slane %v2359_v6, 4 }
 0x38f   :  { %v2463_v20 = vadd.f32 %v2462_v7, %v2359_v6 }
 0x391   :  { %v2464_v9 = vrot.slane %v2463_v20, 2 }
 0x393   :  { %v2465_v24 = vadd.f32 %v2464_v9, %v2463_v20 }
 0x395   :  { %v2466_v10 = vrot.slane %v2465_v24, 1 }
 0x397   :  { %v2467_v13 = vadd.f32 %v2466_v10, %v2465_v24 }
 0x399   :  { %v2468_v14 = vmul.f32 0.125, %v2467_v13 }
 0x39b   :  { %2469 = vst.msk [vmem:[#allocation5] sm:$0x1] %vm2429_vm4, %v2468_v14 }
 0x39c   :  { %2783 = shalt.err (!%p2780_p9)
}
 0x39d   :  { %2489 = dma.vmem_to_hbm [thread:$0]  %s2487_s10, 16, %s3293_s5, [#allocation6]  }
 0x39e   :  { %2792 = dma.done.wait [#allocation4], 16  }
 0x39f   :  { %2793 = vsyncadd [#allocation4], 4294967280 }
 0x3a0   :  { %2794 = dma.done.wait [#allocation6], 16  }
 0x3a1   :  { %2795 = vsyncadd [#allocation6], 4294967280 }
 0x3a2   :  { %2496 = vsyncpa [#allocation4], 1 }
 0x3a3   :  { %2497 = vsyncpa [#allocation6], 1 }

</bundles_post_ra>
